<compile_context>
chip_gen: v5e
topology: v5e:2x2
jax: 0.10.0
libtpu: 0.0.40
codegen_flags: <defaults>
</compile_context>

<pallas_src>
import functools

import jax
import jax.numpy as jnp
from jax import lax
from jax.experimental import pallas as pl
from jax.experimental.pallas import tpu as pltpu

DELTA = 1.0
WEIGHT_HIGH = 1.0
WEIGHT_LOW = 2.0

_LANES = 128
_SUBLANES = 8
_GRAN = _SUBLANES * _LANES       # 1024-element slab
_TILE_ROWS = 4096                # rows per grid step: 2 MiB f32 per input block
_MAX_SPLITS = 2                  # leading "parallel" axis (v7x has 2 TensorCores)


def _ceil_div(a, b):
    return (a + b - 1) // b


def _loss_elems(pred, true, delta, weight_high, weight_low):
    """Elementwise weighted-Huber loss in f32 (shared by kernel and tail path)."""
    err = pred.astype(jnp.float32) - true.astype(jnp.float32)
    abs_err = jnp.abs(err)
    w = jnp.where(err > 0, jnp.float32(weight_high), jnp.float32(weight_low))
    quad = jnp.float32(0.5 * weight_low) * abs_err * abs_err
    # Scalars folded in Python: (wh*delta)*|e| - (0.5*wh*delta^2)  -> one mul + one sub.
    lin = (jnp.float32(weight_high * delta) * abs_err
           - jnp.float32(0.5 * weight_high * delta * delta))
    return w * jnp.where(abs_err < jnp.float32(delta), quad, lin)


def _whl_kernel(pred_ref, true_ref, out_ref, *, tile_rows, tiles_per_core,
                n_tiles, n_full_tiles, last_rows, delta, weight_high,
                weight_low):
    c = pl.program_id(0)               # core-split axis ("parallel")
    i = pl.program_id(1)               # reduction axis ("arbitrary")
    tile = c * tiles_per_core + i      # intended (unclamped) tile index

    @pl.when(i == 0)
    def _():
        out_ref[...] = jnp.zeros_like(out_ref)

    loss = _loss_elems(pred_ref[...], true_ref[...], delta, weight_high,
                       weight_low)

    def _fold(x):
        # Fold rows into the resident (8, 128) accumulator: pure vreg adds,
        # no cross-lane work until the tiny wrapper-side reduce.
        return jnp.sum(x.reshape(tile_rows // _SUBLANES, _SUBLANES, _LANES),
                       axis=0)

    # Full, in-range tiles: no per-element mask needed.
    @pl.when(tile < n_full_tiles)
    def _():
        out_ref[...] += _fold(loss)

    if last_rows > 0:
        # Exactly one statically-known ragged last tile: mask its
        # out-of-range rows (Pallas leaves them undefined) with a local row
        # index vs. a static bound -- cheap and overflow-free.
        @pl.when(tile == n_tiles - 1)
        def _():
            row = lax.broadcasted_iota(jnp.int32, (tile_rows, _LANES), 0)
            out_ref[...] += _fold(
                jnp.where(row < last_rows, loss, jnp.float32(0.0)))
    # Clamped duplicate tiles (tile >= n_tiles) fall through: no accumulation.


def weighted_huber_loss(y_pred, y_true, *, delta=DELTA,
                        weight_high=WEIGHT_HIGH, weight_low=WEIGHT_LOW):
    assert y_pred.shape == y_true.shape
    # Zero-padded elements (tiny-input path) rely on abs_err == 0 falling in
    # the quadratic branch and contributing exactly 0, which needs delta > 0.
    assert delta > 0.0
    n_valid = int(y_pred.size)
    assert n_valid > 0

    p_flat = jnp.ravel(y_pred)          # keep native dtype; upcast in-kernel
    t_flat = jnp.ravel(y_true)

    main = (n_valid // _GRAN) * _GRAN
    tail_sum = jnp.float32(0.0)

    if main == 0:
        # Tiny input (< 1024 elements): pad once to a single 8x128 slab.
        pad = _GRAN - n_valid
        p_main = jnp.pad(p_flat, (0, pad))
        t_main = jnp.pad(t_flat, (0, pad))
        main = _GRAN
    elif main == n_valid:
        p_main, t_main = p_flat, t_flat                     # no copy at all
    else:
        # Largest multiple-of-1024 prefix goes through the kernel (no full
        # padded copy); the < 1024-element tail is reduced in plain JAX.
        p_main, t_main = p_flat[:main], t_flat[:main]
        tail_sum = jnp.sum(_loss_elems(p_flat[main:], t_flat[main:], delta,
                                       weight_high, weight_low))

    rows = main // _LANES                      # multiple of 8
    p_main = p_main.reshape(rows, _LANES)      # lane-dense layout, free reshape
    t_main = t_main.reshape(rows, _LANES)

    tile_rows = min(_TILE_ROWS, rows)          # multiple of 8
    n_tiles = _ceil_div(rows, tile_rows)
    n_full_tiles = rows // tile_rows
    last_rows = rows - n_full_tiles * tile_rows
    num_splits = min(_MAX_SPLITS, n_tiles)
    tiles_per_core = _ceil_div(n_tiles, num_splits)

    def in_map(c, i):
        # Clamp so the (at most one, pl.when-gated) duplicate tile never
        # starts a DMA past the array.
        return (jnp.minimum(c * tiles_per_core + i, n_tiles - 1), 0)

    kernel = functools.partial(
        _whl_kernel, tile_rows=tile_rows, tiles_per_core=tiles_per_core,
        n_tiles=n_tiles, n_full_tiles=n_full_tiles, last_rows=last_rows,
        delta=delta, weight_high=weight_high, weight_low=weight_low)

    partials = pl.pallas_call(
        kernel,
        out_shape=jax.ShapeDtypeStruct((num_splits * _SUBLANES, _LANES),
                                       jnp.float32),
        grid_spec=pltpu.PrefetchScalarGridSpec(
            num_scalar_prefetch=0,
            grid=(num_splits, tiles_per_core),
            in_specs=[
                pl.BlockSpec((tile_rows, _LANES), in_map),
                pl.BlockSpec((tile_rows, _LANES), in_map),
            ],
            out_specs=pl.BlockSpec((_SUBLANES, _LANES), lambda c, i: (c, 0)),
        ),
        compiler_params=pltpu.CompilerParams(
            # TODO(synk): on v7x, switch the leading axis to pltpu.CORE_PARALLEL
            # (or pl.core_map) if xprof shows the megacore split not engaging.
            dimension_semantics=("parallel", "arbitrary")),
    )(p_main, t_main)

    # Tiny (<=16,128) cross-lane reduce + mean divide in the wrapper.
    return (jnp.sum(partials) + tail_sum) / jnp.float32(n_valid)


def _reference(y_pred, y_true, delta=DELTA, wh=WEIGHT_HIGH, wl=WEIGHT_LOW):
    err = y_pred.astype(jnp.float32) - y_true.astype(jnp.float32)
    abs_err = jnp.abs(err)
    w = jnp.where(err > 0, wh, wl)
    quad = wl * 0.5 * abs_err * abs_err
    lin = wh * (delta * abs_err - 0.5 * delta * delta)
    return jnp.mean(w * jnp.where(abs_err < delta, quad, lin))


if __name__ == "__main__":
    key = jax.random.PRNGKey(0)
    k1, k2, k3, k4 = jax.random.split(key, 4)

    # NCHW-style inputs (layout-agnostic for this elementwise + mean-reduce loss).
    shape = (2, 4, 16, 16)                           # 2048 elems: pure kernel path
    y_pred = jax.random.normal(k1, shape, dtype=jnp.float32) * 2.0
    y_true = jax.random.normal(k2, shape, dtype=jnp.float32) * 2.0
    loss = weighted_huber_loss(y_pred, y_true)
    jax.block_until_ready(loss)
    ref = _reference(y_pred, y_true)
    assert jnp.allclose(loss, ref, rtol=1e-5, atol=1e-5), (loss, ref)

    # Non-multiple-of-1024 size: exercises the kernel prefix + plain-JAX tail.
    shape2 = (3, 5, 7, 11)                           # 1155 elems
    y_pred2 = jax.random.normal(k3, shape2, dtype=jnp.float32) * 2.0
    y_true2 = jax.random.normal(k4, shape2, dtype=jnp.float32) * 2.0
    loss2 = weighted_huber_loss(y_pred2, y_true2)
    jax.block_until_ready(loss2)
    ref2 = _reference(y_pred2, y_true2)
    assert jnp.allclose(loss2, ref2, rtol=1e-5, atol=1e-5), (loss2, ref2)

    print("KERNEL_OK")
</pallas_src>

<mosaic_0001>
module attributes {stable_mosaic.version = 11 : i64} {
  func.func @_whl_kernel(%arg0: i32, %arg1: i32, %arg2: memref<16x128xf32, #tpu.memory_space<vmem>>, %arg3: memref<16x128xf32, #tpu.memory_space<vmem>>, %arg4: memref<8x128xf32, #tpu.memory_space<vmem>>) attributes {dimension_semantics = [#tpu.dimension_semantics<parallel>, #tpu.dimension_semantics<arbitrary>], iteration_bounds = array<i64: 1, 1>, scalar_prefetch = 0 : i64, scratch_operands = 0 : i64, tpu.core_type = #tpu.core_type<tc>, window_params = [{transform_indices = @transform_0, window_bounds = array<i64: 16, 128>}, {transform_indices = @transform_1, window_bounds = array<i64: 16, 128>}, {transform_indices = @transform_2, window_bounds = array<i64: 8, 128>}]} {
    %c1_i32 = arith.constant 1 : i32
    %0 = arith.muli %arg0, %c1_i32 : i32
    %1 = arith.addi %0, %arg1 : i32
    %c0_i32 = arith.constant 0 : i32
    %2 = arith.cmpi eq, %arg1, %c0_i32 : i32
    %3 = arith.extui %2 : i1 to i32
    %c0_i32_0 = arith.constant 0 : i32
    %4 = arith.cmpi ne, %3, %c0_i32_0 : i32
    scf.if %4 {
      %cst_12 = arith.constant 0.000000e+00 : f32
      %28 = vector.broadcast %cst_12 : f32 to vector<8x128xf32>
      %c0_13 = arith.constant 0 : index
      %c0_14 = arith.constant 0 : index
      %29 = vector.load %arg4[%c0_13, %c0_14] : memref<8x128xf32, #tpu.memory_space<vmem>>, vector<8x128xf32>
      tpu.vector_store %arg4[%c0_13, %c0_14], %28 {strides = array<i32>} : memref<8x128xf32, #tpu.memory_space<vmem>>, vector<8x128xf32>,
    } else {
    }
    %c0 = arith.constant 0 : index
    %c0_1 = arith.constant 0 : index
    %5 = vector.load %arg2[%c0, %c0_1] : memref<16x128xf32, #tpu.memory_space<vmem>>, vector<16x128xf32>
    %c0_2 = arith.constant 0 : index
    %c0_3 = arith.constant 0 : index
    %6 = vector.load %arg3[%c0_2, %c0_3] : memref<16x128xf32, #tpu.memory_space<vmem>>, vector<16x128xf32>
    %7 = arith.subf %5, %6 : vector<16x128xf32>
    %8 = math.absf %7 : vector<16x128xf32>
    %cst = arith.constant 0.000000e+00 : f32
    %9 = vector.broadcast %cst : f32 to vector<16x128xf32>
    %10 = arith.cmpf ogt, %7, %9 : vector<16x128xf32>
    %cst_4 = arith.constant 1.000000e+00 : f32
    %cst_5 = arith.constant 2.000000e+00 : f32
    %11 = vector.broadcast %cst_4 : f32 to vector<16x128xf32>
    %12 = vector.broadcast %cst_5 : f32 to vector<16x128xf32>
    %13 = arith.select %10, %11, %12 : vector<16x128xi1>, vector<16x128xf32>
    %cst_6 = arith.constant 1.000000e+00 : f32
    %14 = vector.broadcast %cst_6 : f32 to vector<16x128xf32>
    %15 = arith.mulf %14, %8 : vector<16x128xf32>
    %16 = arith.mulf %15, %8 : vector<16x128xf32>
    %cst_7 = arith.constant 1.000000e+00 : f32
    %17 = vector.broadcast %cst_7 : f32 to vector<16x128xf32>
    %18 = arith.mulf %17, %8 : vector<16x128xf32>
    %cst_8 = arith.constant 5.000000e-01 : f32
    %19 = vector.broadcast %cst_8 : f32 to vector<16x128xf32>
    %20 = arith.subf %18, %19 : vector<16x128xf32>
    %cst_9 = arith.constant 1.000000e+00 : f32
    %21 = vector.broadcast %cst_9 : f32 to vector<16x128xf32>
    %22 = arith.cmpf olt, %8, %21 : vector<16x128xf32>
    %23 = arith.select %22, %16, %20 : vector<16x128xi1>, vector<16x128xf32>
    %24 = arith.mulf %13, %23 : vector<16x128xf32>
    %c1_i32_10 = arith.constant 1 : i32
    %25 = arith.cmpi slt, %1, %c1_i32_10 : i32
    %26 = arith.extui %25 : i1 to i32
    %c0_i32_11 = arith.constant 0 : i32
    %27 = arith.cmpi ne, %26, %c0_i32_11 : i32
    scf.if %27 {
      %c0_12 = arith.constant 0 : index
      %c0_13 = arith.constant 0 : index
      %28 = vector.load %arg4[%c0_12, %c0_13] : memref<8x128xf32, #tpu.memory_space<vmem>>, vector<8x128xf32>
      %29 = vector.shape_cast %24 : vector<16x128xf32> to vector<2x8x128xf32>
      %cst_14 = arith.constant dense<0.000000e+00> : vector<8x128xf32>
      %30 = vector.multi_reduction <add>, %29, %cst_14 [0] : vector<2x8x128xf32> to vector<8x128xf32>
      %31 = arith.addf %28, %30 : vector<8x128xf32>
      %c0_15 = arith.constant 0 : index
      %c0_16 = arith.constant 0 : index
      %32 = vector.load %arg4[%c0_15, %c0_16] : memref<8x128xf32, #tpu.memory_space<vmem>>, vector<8x128xf32>
      tpu.vector_store %arg4[%c0_15, %c0_16], %31 {strides = array<i32>} : memref<8x128xf32, #tpu.memory_space<vmem>>, vector<8x128xf32>,
    } else {
    }
    return
  }
  func.func @transform_0(%arg0: i32, %arg1: i32) -> (i32, i32) {
    %c1_i32 = arith.constant 1 : i32
    %0 = arith.muli %arg0, %c1_i32 : i32
    %1 = arith.addi %0, %arg1 : i32
    %c0_i32 = arith.constant 0 : i32
    %2 = arith.minsi %1, %c0_i32 : i32
    %c0_i32_0 = arith.constant 0 : i32
    %c0_i32_1 = arith.constant 0 : i32
    return %2, %c0_i32_0 : i32, i32
  }
  func.func @transform_1(%arg0: i32, %arg1: i32) -> (i32, i32) {
    %c1_i32 = arith.constant 1 : i32
    %0 = arith.muli %arg0, %c1_i32 : i32
    %1 = arith.addi %0, %arg1 : i32
    %c0_i32 = arith.constant 0 : i32
    %2 = arith.minsi %1, %c0_i32 : i32
    %c0_i32_0 = arith.constant 0 : i32
    %c0_i32_1 = arith.constant 0 : i32
    return %2, %c0_i32_0 : i32, i32
  }
  func.func @transform_2(%arg0: i32, %arg1: i32) -> (i32, i32) {
    %c0_i32 = arith.constant 0 : i32
    %c0_i32_0 = arith.constant 0 : i32
    return %arg0, %c0_i32 : i32, i32
  }
}

</mosaic_0001>

<bundles_post_ra>
// kernel: tpu_custom_call.1
= control target key start
LH: loop header
LB: loop body
LE: loop exit
PB: predicated region body
PF: predicated region fallthrough
CT: control target
= control target key end

     0   :  { %7 = vsyncpa [#allocation3], 0  ;;  %s239_s0 = inlined_call_operand.hbm [shape: f32[16,128], index: 0, kind: input, shape index: {}]   ;;  %s240_s1 = inlined_call_operand.hbm [shape: f32[16,128], index: 1, kind: input, shape index: {}]   ;;  %s241_s2 = inlined_call_operand.hbm [shape: f32[8,128], index: 2, kind: output, shape index: {}]  }
   0x1   :  { %8 = vsyncpa [#allocation6], 0 }
   0x2   :  { %9 = vsyncpa [#allocation4], 0  ;;  %s20_s11 = sshll.u32 %s239_s0, 4  ;;  %s209_s12 = smov [#allocation2]   ;;  %s21_s11 = int_to_ptr.hbm [resolvable:$true] %s20_s11 }
   0x3   :  { %s22_s13 = sshll.u32 %s209_s12, 4  ;;  %s39_s16 = sshll.u32 %s240_s1, 4  ;;  %s23_s13 = int_to_ptr.vmem [resolvable:$true] %s22_s13  ;;  %s40_s16 = int_to_ptr.hbm [resolvable:$true] %s39_s16 }
   0x4   :  { %s210_s17 = smov 128   ;;  %s211_s18 = smov 8  }
   0x5   :  { %28 = dma.hbm_to_vmem [thread:$0]  %s21_s11, 256, %s23_s13, [#allocation3], %s210_s17, %s210_s17, %s211_s18  }
   0x6   :  { %s212_s19 = smov [#allocation5]  }
   0x7   :  { %s41_s20 = sshll.u32 %s212_s19, 4  ;;  %s42_s20 = int_to_ptr.vmem [resolvable:$true] %s41_s20 }
   0x8   :  { %47 = dma.hbm_to_vmem [thread:$0]  %s40_s16, 256, %s42_s20, [#allocation6], %s210_s17, %s210_s17, %s211_s18  }
   0x9   :  { %203 = dma.done.wait [#allocation3], 256  }
   0xa   :  { %204 = vsyncadd [#allocation3], 4294967040 }
   0xb   :  { %205 = dma.done.wait [#allocation6], 256  }
   0xc   :  { %206 = vsyncadd [#allocation6], 4294967040  ;;  %v70_v0 = vld [vmem:[#allocation2] sm:$0xff]  ;;  %v71_v1 = vld [vmem:[#allocation2 + $0x8] sm:$0xff]  ;;  %v213_v8 = vmov 2.0   ;;  %s214_s0 = smov [#allocation7]  }
   0xd   :  { %v72_v2 = vld [vmem:[#allocation5] sm:$0xff]  ;;  %v73_v3 = vld [vmem:[#allocation5 + $0x8] sm:$0xff]  ;;  %s105_s1 = sshll.u32 %s214_s0, 4  ;;  %s107_s23 = sshll.u32 %s241_s2, 4  ;;  %s106_s1 = int_to_ptr.vmem [resolvable:$true] %s105_s1  ;;  %s108_s23 = int_to_ptr.hbm [resolvable:$true] %s107_s23 }
   0xe   :  { %v74_v4 = vsub.f32 %v70_v0, %v72_v2  ;;  %v75_v5 = vsub.f32 %v71_v1, %v73_v3 }
  0x10   :  { %v76_v6 = vand.u32 2147483647, %v74_v4  ;;  %vm78_vm0 = vcmp.gt.f32.partialorder %v74_v4, 0.0  ;;  %v77_v7 = vand.u32 2147483647, %v75_v5  ;;  %vm79_vm1 = vcmp.gt.f32.partialorder %v75_v5, 0.0 }
  0x11   :  { %v80_v9 = vsel %vm78_vm0, 1.0, %v213_v8  ;;  %v81_v12 = vsel %vm79_vm1, 1.0, %v213_v8 }
  0x12   :  { %v82_v10 = vmul.f32 %v76_v6, %v76_v6  ;;  %v122_v11 = vadd.f32 -0.5, %v76_v6  ;;  %vm86_vm2 = vcmp.lt.f32.partialorder %v76_v6, 1.0  ;;  %v83_v13 = vmul.f32 %v77_v7, %v77_v7 }
  0x13   :  { %v123_v14 = vadd.f32 -0.5, %v77_v7  ;;  %vm87_vm3 = vcmp.lt.f32.partialorder %v77_v7, 1.0 }
  0x14   :  { %v88_v15 = vsel %vm86_vm2, %v82_v10, %v122_v11 }
  0x15   :  { %v89_v16 = vsel %vm87_vm3, %v83_v13, %v123_v14  ;;  %v90_v17 = vmul.f32 %v88_v15, %v80_v9 }
  0x16   :  { %v91_v18 = vmul.f32 %v89_v16, %v81_v12 }
  0x18   :  { %v97_v19 = vadd.f32 %v91_v18, %v90_v17 }
  0x1a   :  { %99 = vst [vmem:[#allocation7] sm:$0xff] %v97_v19 }
  0x1b   :  { %110 = dma.vmem_to_hbm [thread:$0]  %s106_s1, 128, %s108_s23, [#allocation4]  }
  0x1c   :  { %207 = dma.done.wait [#allocation4], 128  }
  0x1d   :  { %208 = vsyncadd [#allocation4], 4294967168 }
  0x1e   :  { %115 = vsyncpa [#allocation3], 1 }
  0x1f   :  { %116 = vsyncpa [#allocation6], 1 }
  0x20   :  { %117 = vsyncpa [#allocation4], 1 }

</bundles_post_ra>
